<compile_context>
chip_gen: v5e
topology: v5e:2x2
jax: 0.10.0
libtpu: 0.0.40
codegen_flags: <defaults>
</compile_context>

<pallas_src>
import functools

import jax
import jax.numpy as jnp
from jax import lax
from jax.experimental import pallas as pl
from jax.experimental.pallas import tpu as pltpu


_VMEM_LIMIT = 48 * 1024 * 1024   # below v7x's 64 MiB physical VMEM; fine on v5e/v6e


# ------------------------------ tile helpers -------------------------------- #
def _round_up(x, m):
    return (x + m - 1) // m * m


def _pick_tile(dim, prefs):
    """Largest preferred tile that evenly divides `dim`; else full extent."""
    for p in prefs:
        if dim % p == 0:
            return p
    return dim


def _row_tiling(m):
    """Pick (tile_m, padded_M) for the matmul row dim; pad rather than shrink."""
    for t in (1024, 512, 256, 128):
        if m % t == 0:
            return t, m
    if m <= 512:
        t = _round_up(m, 8)
        return t, t
    return 256, _round_up(m, 256)


# ------------------------------ linear kernel ------------------------------- #
def _linear_kernel(x_ref, w_ref, b_ref, o_ref, acc_ref):
    kk = pl.program_id(2)

    @pl.when(kk == 0)
    def _init():
        acc_ref[...] = jnp.zeros_like(acc_ref)

    acc_ref[...] += jnp.dot(x_ref[...], w_ref[...],
                            preferred_element_type=jnp.float32)

    @pl.when(kk == pl.num_programs(2) - 1)
    def _finalize():
        o_ref[...] = (acc_ref[...] + b_ref[...]).astype(o_ref.dtype)


def pallas_linear(x2d, w, b, *, out_dtype=None):
    """y = x2d @ w + b. Operands should already be in the desired compute dtype."""
    M, K = x2d.shape
    Nout = w.shape[1]
    out_dtype = out_dtype or x2d.dtype

    tn = _pick_tile(Nout, (512, 256, 128))
    tk = _pick_tile(K, (512, 256, 128))
    tm, m_pad = _row_tiling(M)
    if m_pad != M:
        x2d = jnp.pad(x2d, ((0, m_pad - M), (0, 0)))

    grid = (m_pad // tm, Nout // tn, K // tk)

    x_item = jnp.dtype(x2d.dtype).itemsize
    w_item = jnp.dtype(w.dtype).itemsize
    o_item = jnp.dtype(out_dtype).itemsize
    cost = pl.CostEstimate(
        flops=2 * m_pad * K * Nout,
        transcendentals=0,
        # x is re-streamed once per Nout tile, w once per row tile.
        bytes_accessed=(m_pad * K * x_item) * grid[1]
        + (K * Nout * w_item) * grid[0]
        + m_pad * Nout * o_item,
    )

    out = pl.pallas_call(
        _linear_kernel,
        out_shape=jax.ShapeDtypeStruct((m_pad, Nout), out_dtype),
        grid=grid,
        in_specs=[
            pl.BlockSpec((tm, tk), lambda i, j, kk: (i, kk)),
            pl.BlockSpec((tk, tn), lambda i, j, kk: (kk, j)),
            pl.BlockSpec((1, tn), lambda i, j, kk: (0, j)),
        ],
        out_specs=pl.BlockSpec((tm, tn), lambda i, j, kk: (i, j)),
        scratch_shapes=[pltpu.VMEM((tm, tn), jnp.float32)],
        compiler_params=pltpu.CompilerParams(
            dimension_semantics=("parallel", "parallel", "arbitrary"),
            vmem_limit_bytes=_VMEM_LIMIT,
        ),
        cost_estimate=cost,
    )(x2d, w, b.reshape(1, Nout))
    return out[:M] if m_pad != M else out


# --------------------------- fused flash attention --------------------------- #
def _mha_kernel(q_ref, k_ref, v_ref, o_ref, m_sc, l_sc, acc_sc,
                *, num_heads, kv_len, block_k, masked):
    ki = pl.program_id(2)

    @pl.when(ki == 0)
    def _init():
        m_sc[...] = jnp.full_like(m_sc, -jnp.inf)
        l_sc[...] = jnp.zeros_like(l_sc)
        acc_sc[...] = jnp.zeros_like(acc_sc)

    if masked:
        kv_idx = ki * block_k + lax.broadcasted_iota(jnp.int32, (1, block_k), 1)
        valid = kv_idx < kv_len                      # (1, tk), broadcast over rows

    # Static unroll over heads: one (batch, q-tile) grid step handles all heads, so
    # per-grid-step overhead is amortized and the head split never leaves the kernel.
    for h in range(num_heads):
        q = q_ref[:, h, :]                           # (tq, D); scale folded into w_qkv
        k = k_ref[:, h, :]                           # (tk, D)
        v = v_ref[:, h, :]                           # (tk, D)

        # q @ k^T contracting the last dims -> no explicit transpose of k.
        s = lax.dot_general(q, k, (((1,), (1,)), ((), ())),
                            preferred_element_type=jnp.float32)   # (tq, tk)
        if masked:
            s = jnp.where(valid, s, -1e30)

        m_prev = m_sc[h]                             # (tq, 1)
        m_new = jnp.maximum(m_prev, jnp.max(s, axis=-1, keepdims=True))
        alpha = jnp.exp(m_prev - m_new)
        # TODO(synk): on v6e/v7x compute this exp in bf16 (bf16 EUP) once validated.
        p = jnp.exp(s - m_new)                       # unnormalized probs (f32)
        l_sc[h] = alpha * l_sc[h] + jnp.sum(p, axis=-1, keepdims=True)
        acc_sc[h] = alpha * acc_sc[h] + jnp.dot(
            p.astype(v.dtype), v, preferred_element_type=jnp.float32)
        m_sc[h] = m_new

    @pl.when(ki == pl.num_programs(2) - 1)
    def _finalize():
        for h in range(num_heads):
            inv_l = pl.reciprocal(l_sc[h], approx=True)    # deferred normalization
            o_ref[:, h, :] = (acc_sc[h] * inv_l).astype(o_ref.dtype)


def pallas_mha(qkv):
    """Online-softmax attention over qkv of shape (B, N, 3, H, D) -> (B, N, H, D).

    The softmax scale must already be folded into the q columns of the qkv weights.
    """
    B, N, three, H, D = qkv.shape
    assert three == 3

    if N <= 128:
        tq = tk = N
        n_pad = N
    else:
        n_pad = _round_up(N, 128)
        tq = 128
        tk = next(t for t in (512, 256, 128) if n_pad % t == 0)   # fat kv blocks
    masked = n_pad != N
    if masked:
        # Pad the sequence so flash tiling (and the VMEM budget) survives shapes
        # like N=197; the padded kv tail is masked to -inf inside the kernel.
        qkv = jnp.pad(qkv, ((0, 0), (0, n_pad - N), (0, 0), (0, 0), (0, 0)))

    grid = (B, n_pad // tq, n_pad // tk)

    item = jnp.dtype(qkv.dtype).itemsize
    tokens = B * n_pad * H * D
    cost = pl.CostEstimate(
        flops=4 * B * H * n_pad * n_pad * D,
        transcendentals=B * H * n_pad * n_pad,
        # q read once, o written once, k/v each streamed once per q tile.
        bytes_accessed=tokens * item * (2 + 2 * (n_pad // tq)),
    )

    kern = functools.partial(_mha_kernel, num_heads=H, kv_len=N, block_k=tk,
                             masked=masked)

    # Squeezed BlockSpecs select the q/k/v plane of the (B, N, 3, H, D) view, so the
    # head split is done by the DMA index_map instead of XLA transposes.
    # TODO(synk): add pipeline_mode=pl.Buffered(3) on k/v specs if a profile shows
    # exposed DMA on the kv stream.
    q_spec = pl.BlockSpec((None, tq, None, H, D), lambda b, qi, ki: (b, qi, 0, 0, 0))
    k_spec = pl.BlockSpec((None, tk, None, H, D), lambda b, qi, ki: (b, ki, 1, 0, 0))
    v_spec = pl.BlockSpec((None, tk, None, H, D), lambda b, qi, ki: (b, ki, 2, 0, 0))
    o_spec = pl.BlockSpec((None, tq, H, D), lambda b, qi, ki: (b, qi, 0, 0))

    out = pl.pallas_call(
        kern,
        out_shape=jax.ShapeDtypeStruct((B, n_pad, H, D), qkv.dtype),
        grid=grid,
        in_specs=[q_spec, k_spec, v_spec],
        out_specs=o_spec,
        scratch_shapes=[
            pltpu.VMEM((H, tq, 1), jnp.float32),   # running max
            pltpu.VMEM((H, tq, 1), jnp.float32),   # running sum
            pltpu.VMEM((H, tq, D), jnp.float32),   # output accumulator
        ],
        compiler_params=pltpu.CompilerParams(
            dimension_semantics=("parallel", "parallel", "arbitrary"),
            vmem_limit_bytes=_VMEM_LIMIT,
        ),
        cost_estimate=cost,
    )(qkv, qkv, qkv)
    return out[:, :N] if masked else out


# ---------------------------------- module ---------------------------------- #
class MultiHeadAttentionPallas:
    def __init__(self, dim, num_heads=8, qkv_bias=False, key=None,
                 compute_dtype=jnp.bfloat16):
        assert dim % num_heads == 0
        self.dim = dim
        self.num_heads = num_heads
        head_dim = dim // num_heads
        self.scale = head_dim ** (-0.5)
        self.compute_dtype = compute_dtype   # bf16 MXU path by default; f32 allowed

        if key is None:
            key = jax.random.PRNGKey(42)
        k1, k2, k3 = jax.random.split(key, 3)

        # Raw f32 parameters, stored (in, out) so y = x @ W + b (== PyTorch x @ W.T + b).
        self.w_qkv = 0.02 * jax.random.normal(k1, (dim, dim * 3), jnp.float32)
        self.b_qkv = (0.02 * jax.random.normal(k3, (dim * 3,), jnp.float32)
                      if qkv_bias else jnp.zeros((dim * 3,), jnp.float32))
        self.w_proj = 0.02 * jax.random.normal(k2, (dim, dim), jnp.float32)
        self.b_proj = jnp.zeros((dim,), jnp.float32)   # nn.Linear proj has bias

        # Kernel-side parameters: softmax scale folded into the q columns (the first
        # `dim` output columns -> q after the (3, H, D) column split), weights pre-cast
        # to the compute dtype (halves DMA bytes, no in-kernel casts); biases stay f32
        # and are added to the f32 accumulator.
        qcol_scale = jnp.concatenate([jnp.full((dim,), self.scale, jnp.float32),
                                      jnp.ones((2 * dim,), jnp.float32)])
        self._w_qkv_k = (self.w_qkv * qcol_scale[None, :]).astype(compute_dtype)
        self._b_qkv_k = self.b_qkv * qcol_scale
        self._w_proj_k = self.w_proj.astype(compute_dtype)
        self._b_proj_k = self.b_proj

    def __call__(self, x):
        B, N, C = x.shape
        H = self.num_heads
        D = C // H
        cd = self.compute_dtype

        # attn_drop / proj_drop are p=0.0 in the reference module -> identity; omitted.
        x2d = x.reshape(B * N, C).astype(cd)
        qkv = pallas_linear(x2d, self._w_qkv_k, self._b_qkv_k, out_dtype=cd)  # (B*N, 3C)
        qkv = qkv.reshape(B, N, 3, H, D)       # free view: columns split as (3, H, D)

        o = pallas_mha(qkv)                    # (B, N, H, D), no XLA head transposes
        o2d = o.reshape(B * N, C)              # free view (head merge)

        out = pallas_linear(o2d, self._w_proj_k, self._b_proj_k, out_dtype=x.dtype)
        return out.reshape(B, N, C)


# ----------------------------- pure-JAX reference ---------------------------- #
def reference_forward(mod, x):
    B, N, C = x.shape
    H, D = mod.num_heads, C // mod.num_heads
    qkv = x.reshape(B * N, C) @ mod.w_qkv + mod.b_qkv
    qkv = qkv.reshape(B, N, 3, H, D).transpose(2, 0, 3, 1, 4)
    q, k, v = qkv[0], qkv[1], qkv[2]
    attn = jnp.einsum("bhnd,bhmd->bhnm", q, k) * mod.scale
    attn = jax.nn.softmax(attn, axis=-1)
    o = jnp.einsum("bhnm,bhmd->bhnd", attn, v)
    o = o.transpose(0, 2, 1, 3).reshape(B * N, C)
    out = o @ mod.w_proj + mod.b_proj
    return out.reshape(B, N, C)


# ------------------------------------ main ----------------------------------- #
if __name__ == "__main__":
    def _check(B, N, C, H, seed, compute_dtype, tol, qkv_bias=False):
        x = jax.random.normal(jax.random.PRNGKey(seed), (B, N, C), jnp.float32)
        mod = MultiHeadAttentionPallas(dim=C, num_heads=H, qkv_bias=qkv_bias,
                                       key=jax.random.PRNGKey(seed + 1),
                                       compute_dtype=compute_dtype)
        out = jax.block_until_ready(mod(x))
        ref = reference_forward(mod, x)
        assert out.shape == (B, N, C)
        rel = float(jnp.max(jnp.abs(out - ref)) / (jnp.max(jnp.abs(ref)) + 1e-12))
        assert rel < tol, f"relative error too large: {rel} (tol {tol})"

    # small shape matching the module's (B, N, C) convention (bf16 default path)
    _check(B=2, N=8, C=32, H=8, seed=0, compute_dtype=jnp.bfloat16, tol=5e-2)
    # non-128-multiple sequence: exercises padding + kv masking, multi kv-step flash
    # tiling, multi-tile linear grids and k-axis accumulation (bf16 path, qkv bias)
    _check(B=2, N=320, C=384, H=8, seed=2, compute_dtype=jnp.bfloat16, tol=5e-2,
           qkv_bias=True)
    # f32 compute path sanity check with a tighter tolerance
    _check(B=2, N=64, C=128, H=8, seed=4, compute_dtype=jnp.float32, tol=5e-3)

    print("KERNEL_OK")
</pallas_src>

<mosaic_0001>
module attributes {stable_mosaic.version = 11 : i64} {
  func.func @_linear_kernel(%arg0: i32, %arg1: i32, %arg2: i32, %arg3: memref<16x32xbf16, #tpu.memory_space<vmem>>, %arg4: memref<32x96xbf16, #tpu.memory_space<vmem>>, %arg5: memref<1x96xf32, #tpu.memory_space<vmem>>, %arg6: memref<16x96xbf16, #tpu.memory_space<vmem>>, %arg7: memref<16x96xf32, #tpu.memory_space<vmem>>) attributes {dimension_semantics = [#tpu.dimension_semantics<parallel>, #tpu.dimension_semantics<parallel>, #tpu.dimension_semantics<arbitrary>], iteration_bounds = array<i64: 1, 1, 1>, scalar_prefetch = 0 : i64, scratch_operands = 1 : i64, tpu.core_type = #tpu.core_type<tc>, window_params = [{transform_indices = @transform_0, window_bounds = array<i64: 16, 32>}, {transform_indices = @transform_1, window_bounds = array<i64: 32, 96>}, {transform_indices = @transform_2, window_bounds = array<i64: 1, 96>}, {transform_indices = @transform_3, window_bounds = array<i64: 16, 96>}]} {
    %c0_i32 = arith.constant 0 : i32
    %0 = arith.cmpi eq, %arg2, %c0_i32 : i32
    %1 = arith.extui %0 : i1 to i32
    %c0_i32_0 = arith.constant 0 : i32
    %2 = arith.cmpi ne, %1, %c0_i32_0 : i32
    scf.if %2 {
      %cst_10 = arith.constant 0.000000e+00 : f32
      %12 = vector.broadcast %cst_10 : f32 to vector<16x96xf32>
      %c0_11 = arith.constant 0 : index
      %c0_12 = arith.constant 0 : index
      %13 = vector.load %arg7[%c0_11, %c0_12] : memref<16x96xf32, #tpu.memory_space<vmem>>, vector<16x96xf32>
      tpu.vector_store %arg7[%c0_11, %c0_12], %12 {strides = array<i32>} : memref<16x96xf32, #tpu.memory_space<vmem>>, vector<16x96xf32>,
    } else {
    }
    %c0 = arith.constant 0 : index
    %c0_1 = arith.constant 0 : index
    %3 = vector.load %arg7[%c0, %c0_1] : memref<16x96xf32, #tpu.memory_space<vmem>>, vector<16x96xf32>
    %c0_2 = arith.constant 0 : index
    %c0_3 = arith.constant 0 : index
    %4 = vector.load %arg3[%c0_2, %c0_3] : memref<16x32xbf16, #tpu.memory_space<vmem>>, vector<16x32xbf16>
    %c0_4 = arith.constant 0 : index
    %c0_5 = arith.constant 0 : index
    %5 = vector.load %arg4[%c0_4, %c0_5] : memref<32x96xbf16, #tpu.memory_space<vmem>>, vector<32x96xbf16>
    %cst = arith.constant dense<0.000000e+00> : vector<16x96xf32>
    %6 = tpu.matmul %4, %5, %cst {dimension_numbers = #tpu.dot_dimension_numbers<[1], [0], [0], [1], [0, 0, 1, 1], [], []>} : vector<16x32xbf16>, vector<32x96xbf16>, vector<16x96xf32> -> vector<16x96xf32>
    %7 = arith.addf %3, %6 : vector<16x96xf32>
    %c0_6 = arith.constant 0 : index
    %c0_7 = arith.constant 0 : index
    %8 = vector.load %arg7[%c0_6, %c0_7] : memref<16x96xf32, #tpu.memory_space<vmem>>, vector<16x96xf32>
    tpu.vector_store %arg7[%c0_6, %c0_7], %7 {strides = array<i32>} : memref<16x96xf32, #tpu.memory_space<vmem>>, vector<16x96xf32>,
    %c0_i32_8 = arith.constant 0 : i32
    %9 = arith.cmpi eq, %arg2, %c0_i32_8 : i32
    %10 = arith.extui %9 : i1 to i32
    %c0_i32_9 = arith.constant 0 : i32
    %11 = arith.cmpi ne, %10, %c0_i32_9 : i32
    scf.if %11 {
      %c0_10 = arith.constant 0 : index
      %c0_11 = arith.constant 0 : index
      %12 = vector.load %arg7[%c0_10, %c0_11] : memref<16x96xf32, #tpu.memory_space<vmem>>, vector<16x96xf32>
      %c0_12 = arith.constant 0 : index
      %c0_13 = arith.constant 0 : index
      %13 = vector.load %arg5[%c0_12, %c0_13] : memref<1x96xf32, #tpu.memory_space<vmem>>, vector<1x96xf32>
      %14 = vector.broadcast %13 : vector<1x96xf32> to vector<16x96xf32>
      %15 = arith.addf %12, %14 : vector<16x96xf32>
      %16 = arith.truncf %15 : vector<16x96xf32> to vector<16x96xbf16>
      %c0_14 = arith.constant 0 : index
      %c0_15 = arith.constant 0 : index
      %17 = vector.load %arg6[%c0_14, %c0_15] : memref<16x96xbf16, #tpu.memory_space<vmem>>, vector<16x96xbf16>
      tpu.vector_store %arg6[%c0_14, %c0_15], %16 {strides = array<i32>} : memref<16x96xbf16, #tpu.memory_space<vmem>>, vector<16x96xbf16>,
    } else {
    }
    return
  }
  func.func @transform_0(%arg0: i32, %arg1: i32, %arg2: i32) -> (i32, i32) {
    %c0_i32 = arith.constant 0 : i32
    return %arg0, %arg2 : i32, i32
  }
  func.func @transform_1(%arg0: i32, %arg1: i32, %arg2: i32) -> (i32, i32) {
    %c0_i32 = arith.constant 0 : i32
    return %arg2, %arg1 : i32, i32
  }
  func.func @transform_2(%arg0: i32, %arg1: i32, %arg2: i32) -> (i32, i32) {
    %c0_i32 = arith.constant 0 : i32
    %c0_i32_0 = arith.constant 0 : i32
    return %c0_i32, %arg1 : i32, i32
  }
  func.func @transform_3(%arg0: i32, %arg1: i32, %arg2: i32) -> (i32, i32) {
    %c0_i32 = arith.constant 0 : i32
    return %arg0, %arg1 : i32, i32
  }
}

</mosaic_0001>

<bundles_post_ra>
// kernel: tpu_custom_call.1
= control target key start
LH: loop header
LB: loop body
LE: loop exit
PB: predicated region body
PF: predicated region fallthrough
CT: control target
= control target key end

     0   :  { %8 = vsyncpa [#allocation4], 0  ;;  %s291_s0 = inlined_call_operand.hbm [shape: bf16[16,32], index: 0, kind: input, shape index: {}]   ;;  %s292_s1 = inlined_call_operand.hbm [shape: bf16[32,96], index: 1, kind: input, shape index: {}]   ;;  %s293_s2 = inlined_call_operand.vmem [shape: f32[1,96], index: 2, kind: input, shape index: {}]   ;;  %s294_s3 = inlined_call_operand.hbm [shape: bf16[16,96], index: 3, kind: output, shape index: {}]  }
   0x1   :  { %9 = vsyncpa [#allocation7], 0 }
   0x2   :  { %10 = vsyncpa [#allocation5], 0  ;;  %s15_s14 = sshll.u32 %s291_s0, 4  ;;  %s240_s15 = smov [#allocation3]   ;;  %s16_s14 = int_to_ptr.hbm [resolvable:$true] %s15_s14 }
   0x3   :  { %s17_s16 = sshll.u32 %s240_s15, 4  ;;  %s28_s19 = sshll.u32 %s292_s1, 4  ;;  %s18_s16 = int_to_ptr.vmem [resolvable:$true] %s17_s16  ;;  %s29_s19 = int_to_ptr.hbm [resolvable:$true] %s28_s19 }
   0x4   :  { %s241_s20 = smov 64   ;;  %s242_s21 = smov 4  }
   0x5   :  { %23 = dma.hbm_to_vmem [thread:$0]  %s16_s14, 128, %s18_s16, [#allocation4], %s241_s20, %s241_s20, %s242_s21  }
   0x6   :  { %s243_s22 = smov [#allocation6]  }
   0x7   :  { %s30_s23 = sshll.u32 %s243_s22, 4  ;;  %s31_s23 = int_to_ptr.vmem [resolvable:$true] %s30_s23 }
   0x8   :  { %36 = dma.hbm_to_vmem [thread:$0]  %s29_s19, 256, %s31_s23, [#allocation7], %s241_s20, %s241_s20, %s242_s21  }
   0x9   :  { %234 = dma.done.wait [#allocation4], 128  }
   0xa   :  { %235 = vsyncadd [#allocation4], 4294967168 }
   0xb   :  { %236 = dma.done.wait [#allocation7], 256  }
   0xc   :  { %237 = vsyncadd [#allocation7], 4294967040  ;;  %vm52_vm0 = vcmask 785408   ;;  %v244_v0 = vmov 0.0   ;;  %v154_v1 = vld [vmem:[#allocation6 + $0x8] sm:$0xff]  ;;  %v153_v2 = vld [vmem:[#allocation6] sm:$0xff] }
   0xd   :  { %53 = vst.msk [vmem:[#allocation2] sm:$0xff] %vm52_vm0, %v244_v0  ;;  %90 = vmatpush.bf16.msra.mxu0 %v154_v1  ;;  %v152_v3 = vld [vmem:[#allocation3] sm:$0xff]  ;;  %vm80_vm1 = vcmask 261120   ;;  %v161_v8 = vld [vmem:[%s293_s2] ss:$0 sm:$0xff]  ;;  %vm116_vm2 = vcmask 781312  }
   0xe   :  { %54 = vst.msk [vmem:[#allocation2 + $0x8] sm:$0xff] %vm52_vm0, %v244_v0  ;;  %s245_s24 = smov [#allocation8]   ;;  %s125_s28 = sshll.u32 %s294_s3, 4  ;;  %s126_s28 = int_to_ptr.hbm [resolvable:$true] %s125_s28 }
   0xf   :  { %s123_s25 = sshll.u32 %s245_s24, 4  ;;  %s124_s25 = int_to_ptr.vmem [resolvable:$true] %s123_s25 }
  0x11   :  { %91 = vmatpush.bf16.msra.mxu0 %v153_v2 }
  0x14   :  { %151 = vmatmul.msk.bf16.vlgmr.msra.gmra.mxu0 %vm80_vm1, %v152_v3  ;;  %v55_v4 = vld [vmem:[#allocation2] sm:$0xff] }
  0x15   :  { %v56_v7 = vld [vmem:[#allocation2 + $0x8] sm:$0xff] }
  0x91   :  { %v93_v5 = vpop.f32.mrf.mxu0 }
  0x92   :  { %v98_v6 = vadd.f32 %v93_v5, %v55_v4 }
  0x94   :  { %101 = vst.msk [vmem:[#allocation2] sm:$0xff] %vm52_vm0, %v98_v6 }
  0x99   :  { %v95_v9 = vpop.f32.mrf.mxu0 }
  0x9a   :  { %v99_v10 = vadd.f32 %v95_v9, %v56_v7 }
  0x9b   :  { %v106_v11 = vld [vmem:[#allocation2] sm:$0xff] }
  0x9c   :  { %102 = vst.msk [vmem:[#allocation2 + $0x8] sm:$0xff] %vm52_vm0, %v99_v10  ;;  %v112_v12 = vadd.f32 %v161_v8, %v106_v11 }
  0x9e   :  { %v114_v13 = vpack.c.bf16 %v112_v12, %v112_v12 }
  0xa0   :  { %117 = vst.msk [vmem:[#allocation8] sm:$0xf] %vm116_vm2, %v114_v13 }
  0xa3   :  { %v107_v14 = vld [vmem:[#allocation2 + $0x8] sm:$0xff] }
  0xa4   :  { %v113_v15 = vadd.f32 %v161_v8, %v107_v14 }
  0xa6   :  { %v115_v16 = vpack.c.bf16 %v113_v15, %v113_v15 }
  0xa8   :  { %118 = vst.msk [vmem:[#allocation8 + $0x4] sm:$0xf] %vm116_vm2, %v115_v16 }
  0xa9   :  { %131 = dma.vmem_to_hbm [thread:$0]  %s124_s25, 128, %s126_s28, [#allocation5], %s241_s20, %s241_s20, %s242_s21  }
  0xaa   :  { %238 = dma.done.wait [#allocation5], 128  }
  0xab   :  { %239 = vsyncadd [#allocation5], 4294967168 }
  0xac   :  { %136 = vsyncpa [#allocation4], 1 }
  0xad   :  { %137 = vsyncpa [#allocation7], 1 }
  0xae   :  { %138 = vsyncpa [#allocation5], 1 }

</bundles_post_ra>
